<compile_context>
chip_gen: v5e
topology: v5e:2x2
jax: 0.10.0
libtpu: 0.0.40
codegen_flags: <defaults>
</compile_context>

<pallas_src>
import functools

import jax
import jax.numpy as jnp
import numpy as np
from jax import lax
from jax.experimental import pallas as pl
from jax.experimental.pallas import tpu as pltpu

EPS = 1e-5  # PyTorch BatchNorm2d default eps


# ------------------------- Pallas kernel -------------------------

def conv_bn_kernel(w_ref, p_ref, gamma_ref, beta_ref, o_ref,
                   acc_ref, sum_sc, sq_sc, scale_sc, shift_sc, *, total):
    """Two-phase fused conv + BatchNorm (batch statistics).

    grid = (2, num_tiles):
      phase 0: GEMM tile -> VMEM scratch, accumulate per-channel sum / sumsq;
               on the last tile fold stats into (scale, shift).
      phase 1: stream tiles out of VMEM scratch as y * scale + shift.
    """
    phase = pl.program_id(0)
    i = pl.program_id(1)
    ntiles = pl.num_programs(1)

    @pl.when(jnp.logical_and(phase == 0, i == 0))
    def _():
        sum_sc[...] = jnp.zeros_like(sum_sc)
        sq_sc[...] = jnp.zeros_like(sq_sc)

    @pl.when(phase == 0)
    def _():
        # (Cout, Kdim) @ (Kdim, tile_n) -> (Cout, tile_n), f32 accumulation on MXU.
        y = jnp.dot(w_ref[...], p_ref[...], preferred_element_type=jnp.float32)
        acc_ref[i] = y                                   # conv intermediate stays in VMEM
        sum_sc[...] += jnp.sum(y, axis=1, keepdims=True)
        sq_sc[...] += jnp.sum(y * y, axis=1, keepdims=True)

        @pl.when(i == ntiles - 1)
        def _():
            mean = sum_sc[...] / total
            var = sq_sc[...] / total - mean * mean       # biased variance (PyTorch BN)
            inv = lax.rsqrt(var + EPS)
            scale = gamma_ref[...] * inv
            scale_sc[...] = scale
            shift_sc[...] = beta_ref[...] - mean * scale

    @pl.when(phase == 1)
    def _():
        # pure lane-dense y * scale + shift stream
        o_ref[...] = acc_ref[i] * scale_sc[...] + shift_sc[...]


# ------------------------- wrapper -------------------------

def conv_bn(x_nchw, w, gamma, beta, *, tile_n=None):
    """x: (N, Cin, H, W); w: PyTorch Conv2d weight (Cout, Cin, K, K)."""
    N, Cin, H, W = x_nchw.shape
    Cout, Cin_w, K, K2 = w.shape
    assert Cin == Cin_w and K == K2
    pad = K // 2                     # padding=1 for the k=3 module
    Hout, Wout = H, W
    M = N * Hout * Wout
    Kdim = K * K * Cin               # 36 at the demo shapes -- NOT padded to 128

    # spatial zero-padding (NCHW)
    xp = jnp.pad(x_nchw, ((0, 0), (0, 0), (pad, pad), (pad, pad)))

    # im2col directly in the transposed, lane-dense layout (Kdim, M):
    #   patches_t[kk*Cin + ci, (n*H + h)*W + w] = xp[n, ci, h+dh, w+dw]
    slabs = [xp[:, :, dh:dh + Hout, dw:dw + Wout]
             for dh in range(K) for dw in range(K)]
    patches_t = jnp.stack(slabs, axis=0)                    # (KK, N, Cin, H, W)
    patches_t = jnp.transpose(patches_t, (0, 2, 1, 3, 4))   # (KK, Cin, N, H, W)
    patches_t = patches_t.reshape(Kdim, M).astype(jnp.bfloat16)

    # Conv2d weight (Cout, Cin, kH, kW) -> (Cout, kH, kW, Cin) -> (Cout, Kdim)
    # (cross-correlation: no kernel flip)
    w_lhs = jnp.transpose(w, (0, 2, 3, 1)).reshape(Cout, Kdim).astype(jnp.bfloat16)

    if tile_n is None:
        tile_n = M if M <= 2048 else 2048
    assert M % 128 == 0 and M % tile_n == 0 and tile_n % 128 == 0, \
        "demo shapes must give a lane-aligned, evenly tiled M = N*H*W"
    num_tiles = M // tile_n

    # fused design keeps the full conv intermediate in VMEM
    assert Cout * M * 4 <= 8 * 1024 * 1024, "conv intermediate must fit VMEM scratch"

    gamma2 = gamma.reshape(Cout, 1).astype(jnp.float32)
    beta2 = beta.reshape(Cout, 1).astype(jnp.float32)

    out_t = pl.pallas_call(
        functools.partial(conv_bn_kernel, total=float(M)),
        out_shape=jax.ShapeDtypeStruct((Cout, M), jnp.float32),
        grid_spec=pltpu.PrefetchScalarGridSpec(
            num_scalar_prefetch=0,
            grid=(2, num_tiles),                      # (phase, tile)
            in_specs=[
                # constant small weight block
                pl.BlockSpec((Cout, Kdim), lambda p, i: (0, 0)),
                # patches only needed in phase 0; pin to block 0 during phase 1
                pl.BlockSpec((Kdim, tile_n), lambda p, i: (0, i * (1 - p))),
                pl.BlockSpec((Cout, 1), lambda p, i: (0, 0)),
                pl.BlockSpec((Cout, 1), lambda p, i: (0, 0)),
            ],
            # output only advances during phase 1 (no junk writebacks in phase 0)
            out_specs=pl.BlockSpec((Cout, tile_n), lambda p, i: (0, i * p)),
            scratch_shapes=[
                pltpu.VMEM((num_tiles, Cout, tile_n), jnp.float32),  # conv intermediate
                pltpu.VMEM((Cout, 1), jnp.float32),  # sum
                pltpu.VMEM((Cout, 1), jnp.float32),  # sumsq
                pltpu.VMEM((Cout, 1), jnp.float32),  # scale
                pltpu.VMEM((Cout, 1), jnp.float32),  # shift
            ]),
        compiler_params=pltpu.CompilerParams(
            # both axes sequential: cross-tile stats accumulation + phase ordering
            dimension_semantics=("arbitrary", "arbitrary"),
            vmem_limit_bytes=32 * 1024 * 1024),
    )(w_lhs, patches_t, gamma2, beta2)

    # (Cout, N*H*W) -> (N, Cout, H, W)
    out = out_t.reshape(Cout, N, Hout, Wout)
    return jnp.transpose(out, (1, 0, 2, 3))


# ------------------------- pure-JAX reference -------------------------

def reference(x, w, gamma, beta):
    """f32 conv of bf16-rounded inputs (matches the kernel's MXU path) + BN."""
    Cout, K = w.shape[0], w.shape[2]
    pad = K // 2
    xb = x.astype(jnp.bfloat16).astype(jnp.float32)
    wb = w.astype(jnp.bfloat16).astype(jnp.float32)
    dn = lax.conv_dimension_numbers(x.shape, w.shape, ('NCHW', 'OIHW', 'NCHW'))
    y = lax.conv_general_dilated(xb, wb, (1, 1), [(pad, pad), (pad, pad)],
                                 dimension_numbers=dn)
    mean = jnp.mean(y, axis=(0, 2, 3), keepdims=True)
    var = jnp.mean((y - mean) ** 2, axis=(0, 2, 3), keepdims=True)
    yn = (y - mean) * lax.rsqrt(var + EPS)
    return yn * gamma.reshape(1, Cout, 1, 1) + beta.reshape(1, Cout, 1, 1)


# ------------------------- main -------------------------

if __name__ == "__main__":
    key = jax.random.PRNGKey(0)
    k_x, k_w, k_g, k_b = jax.random.split(key, 4)

    N, Cin, H, W = 2, 4, 16, 16
    Cout, K = 8, 3

    x = jax.random.normal(k_x, (N, Cin, H, W), jnp.float32)
    # Conv2d weight shape: (out_channels, in_channels, kH, kW)
    w = jax.random.normal(k_w, (Cout, Cin, K, K), jnp.float32) * 0.2
    gamma = 1.0 + 0.1 * jax.random.normal(k_g, (Cout,), jnp.float32)
    beta = 0.1 * jax.random.normal(k_b, (Cout,), jnp.float32)

    out = jax.block_until_ready(conv_bn(x, w, gamma, beta))
    ref = jax.block_until_ready(reference(x, w, gamma, beta))

    assert out.shape == (N, Cout, H, W), out.shape
    np.testing.assert_allclose(np.asarray(out), np.asarray(ref),
                               rtol=5e-3, atol=5e-3)
    print("KERNEL_OK")
</pallas_src>

<mosaic_0001>
module attributes {stable_mosaic.version = 11 : i64} {
  func.func @conv_bn_kernel(%arg0: i32, %arg1: i32, %arg2: memref<8x36xbf16, #tpu.memory_space<vmem>>, %arg3: memref<36x512xbf16, #tpu.memory_space<vmem>>, %arg4: memref<8x1xf32, #tpu.memory_space<vmem>>, %arg5: memref<8x1xf32, #tpu.memory_space<vmem>>, %arg6: memref<8x512xf32, #tpu.memory_space<vmem>>, %arg7: memref<1x8x512xf32, #tpu.memory_space<vmem>>, %arg8: memref<8x1xf32, #tpu.memory_space<vmem>>, %arg9: memref<8x1xf32, #tpu.memory_space<vmem>>, %arg10: memref<8x1xf32, #tpu.memory_space<vmem>>, %arg11: memref<8x1xf32, #tpu.memory_space<vmem>>) attributes {dimension_semantics = [#tpu.dimension_semantics<arbitrary>, #tpu.dimension_semantics<arbitrary>], iteration_bounds = array<i64: 2, 1>, scalar_prefetch = 0 : i64, scratch_operands = 5 : i64, tpu.core_type = #tpu.core_type<tc>, window_params = [{pipeline_mode = #tpu.pipeline_mode<synchronous>, transform_indices = @transform_0, window_bounds = array<i64: 8, 36>}, {transform_indices = @transform_1, window_bounds = array<i64: 36, 512>}, {pipeline_mode = #tpu.pipeline_mode<synchronous>, transform_indices = @transform_2, window_bounds = array<i64: 8, 1>}, {pipeline_mode = #tpu.pipeline_mode<synchronous>, transform_indices = @transform_3, window_bounds = array<i64: 8, 1>}, {transform_indices = @transform_4, window_bounds = array<i64: 8, 512>}]} {
    %c0_i32 = arith.constant 0 : i32
    %0 = arith.cmpi eq, %arg0, %c0_i32 : i32
    %c0_i32_0 = arith.constant 0 : i32
    %1 = arith.cmpi eq, %arg1, %c0_i32_0 : i32
    %2 = arith.andi %0, %1 : i1
    %3 = arith.extui %2 : i1 to i32
    %c0_i32_1 = arith.constant 0 : i32
    %4 = arith.cmpi ne, %3, %c0_i32_1 : i32
    scf.if %4 {
      %cst = arith.constant 0.000000e+00 : f32
      %11 = vector.broadcast %cst : f32 to vector<8x1xf32>
      %c0 = arith.constant 0 : index
      %c0_5 = arith.constant 0 : index
      %12 = vector.load %arg8[%c0, %c0_5] : memref<8x1xf32, #tpu.memory_space<vmem>>, vector<8x1xf32>
      tpu.vector_store %arg8[%c0, %c0_5], %11 {strides = array<i32>} : memref<8x1xf32, #tpu.memory_space<vmem>>, vector<8x1xf32>,
      %cst_6 = arith.constant 0.000000e+00 : f32
      %13 = vector.broadcast %cst_6 : f32 to vector<8x1xf32>
      %c0_7 = arith.constant 0 : index
      %c0_8 = arith.constant 0 : index
      %14 = vector.load %arg9[%c0_7, %c0_8] : memref<8x1xf32, #tpu.memory_space<vmem>>, vector<8x1xf32>
      tpu.vector_store %arg9[%c0_7, %c0_8], %13 {strides = array<i32>} : memref<8x1xf32, #tpu.memory_space<vmem>>, vector<8x1xf32>,
    } else {
    }
    %c0_i32_2 = arith.constant 0 : i32
    %5 = arith.cmpi eq, %arg0, %c0_i32_2 : i32
    %6 = arith.extui %5 : i1 to i32
    %c0_i32_3 = arith.constant 0 : i32
    %7 = arith.cmpi ne, %6, %c0_i32_3 : i32
    scf.if %7 {
      %c0 = arith.constant 0 : index
      %c0_5 = arith.constant 0 : index
      %11 = vector.load %arg2[%c0, %c0_5] : memref<8x36xbf16, #tpu.memory_space<vmem>>, vector<8x36xbf16>
      %c0_6 = arith.constant 0 : index
      %c0_7 = arith.constant 0 : index
      %12 = vector.load %arg3[%c0_6, %c0_7] : memref<36x512xbf16, #tpu.memory_space<vmem>>, vector<36x512xbf16>
      %cst = arith.constant dense<0.000000e+00> : vector<8x512xf32>
      %13 = tpu.matmul %11, %12, %cst {dimension_numbers = #tpu.dot_dimension_numbers<[1], [0], [0], [1], [0, 0, 1, 1], [], []>} : vector<8x36xbf16>, vector<36x512xbf16>, vector<8x512xf32> -> vector<8x512xf32>
      %14 = arith.index_cast %arg1 : i32 to index
      %c0_8 = arith.constant 0 : index
      %c0_9 = arith.constant 0 : index
      %15 = vector.load %arg7[%14, %c0_8, %c0_9] : memref<1x8x512xf32, #tpu.memory_space<vmem>>, vector<1x8x512xf32>
      %16 = vector.shape_cast %15 : vector<1x8x512xf32> to vector<8x512xf32>
      %17 = vector.shape_cast %13 : vector<8x512xf32> to vector<1x8x512xf32>
      tpu.vector_store %arg7[%14, %c0_8, %c0_9], %17 {strides = array<i32>} : memref<1x8x512xf32, #tpu.memory_space<vmem>>, vector<1x8x512xf32>,
      %c0_10 = arith.constant 0 : index
      %c0_11 = arith.constant 0 : index
      %18 = vector.load %arg8[%c0_10, %c0_11] : memref<8x1xf32, #tpu.memory_space<vmem>>, vector<8x1xf32>
      %cst_12 = arith.constant dense<0.000000e+00> : vector<8xf32>
      %19 = vector.multi_reduction <add>, %13, %cst_12 [1] : vector<8x512xf32> to vector<8xf32>
      %20 = vector.shape_cast %19 : vector<8xf32> to vector<8x1xf32>
      %21 = arith.addf %18, %20 : vector<8x1xf32>
      %c0_13 = arith.constant 0 : index
      %c0_14 = arith.constant 0 : index
      %22 = vector.load %arg8[%c0_13, %c0_14] : memref<8x1xf32, #tpu.memory_space<vmem>>, vector<8x1xf32>
      tpu.vector_store %arg8[%c0_13, %c0_14], %21 {strides = array<i32>} : memref<8x1xf32, #tpu.memory_space<vmem>>, vector<8x1xf32>,
      %c0_15 = arith.constant 0 : index
      %c0_16 = arith.constant 0 : index
      %23 = vector.load %arg9[%c0_15, %c0_16] : memref<8x1xf32, #tpu.memory_space<vmem>>, vector<8x1xf32>
      %24 = arith.mulf %13, %13 : vector<8x512xf32>
      %cst_17 = arith.constant dense<0.000000e+00> : vector<8xf32>
      %25 = vector.multi_reduction <add>, %24, %cst_17 [1] : vector<8x512xf32> to vector<8xf32>
      %26 = vector.shape_cast %25 : vector<8xf32> to vector<8x1xf32>
      %27 = arith.addf %23, %26 : vector<8x1xf32>
      %c0_18 = arith.constant 0 : index
      %c0_19 = arith.constant 0 : index
      %28 = vector.load %arg9[%c0_18, %c0_19] : memref<8x1xf32, #tpu.memory_space<vmem>>, vector<8x1xf32>
      tpu.vector_store %arg9[%c0_18, %c0_19], %27 {strides = array<i32>} : memref<8x1xf32, #tpu.memory_space<vmem>>, vector<8x1xf32>,
      %c0_i32_20 = arith.constant 0 : i32
      %29 = arith.cmpi eq, %arg1, %c0_i32_20 : i32
      %30 = arith.extui %29 : i1 to i32
      %c0_i32_21 = arith.constant 0 : i32
      %31 = arith.cmpi ne, %30, %c0_i32_21 : i32
      scf.if %31 {
        %c0_22 = arith.constant 0 : index
        %c0_23 = arith.constant 0 : index
        %32 = vector.load %arg8[%c0_22, %c0_23] : memref<8x1xf32, #tpu.memory_space<vmem>>, vector<8x1xf32>
        %cst_24 = arith.constant 5.120000e+02 : f32
        %33 = vector.broadcast %cst_24 : f32 to vector<8x1xf32>
        %34 = arith.divf %32, %33 : vector<8x1xf32>
        %c0_25 = arith.constant 0 : index
        %c0_26 = arith.constant 0 : index
        %35 = vector.load %arg9[%c0_25, %c0_26] : memref<8x1xf32, #tpu.memory_space<vmem>>, vector<8x1xf32>
        %cst_27 = arith.constant 5.120000e+02 : f32
        %36 = vector.broadcast %cst_27 : f32 to vector<8x1xf32>
        %37 = arith.divf %35, %36 : vector<8x1xf32>
        %38 = arith.mulf %34, %34 : vector<8x1xf32>
        %39 = arith.subf %37, %38 : vector<8x1xf32>
        %cst_28 = arith.constant 9.99999974E-6 : f32
        %40 = vector.broadcast %cst_28 : f32 to vector<8x1xf32>
        %41 = arith.addf %39, %40 : vector<8x1xf32>
        %42 = math.rsqrt %41 : vector<8x1xf32>
        %c0_29 = arith.constant 0 : index
        %c0_30 = arith.constant 0 : index
        %43 = vector.load %arg4[%c0_29, %c0_30] : memref<8x1xf32, #tpu.memory_space<vmem>>, vector<8x1xf32>
        %44 = arith.mulf %43, %42 : vector<8x1xf32>
        %c0_31 = arith.constant 0 : index
        %c0_32 = arith.constant 0 : index
        %45 = vector.load %arg10[%c0_31, %c0_32] : memref<8x1xf32, #tpu.memory_space<vmem>>, vector<8x1xf32>
        tpu.vector_store %arg10[%c0_31, %c0_32], %44 {strides = array<i32>} : memref<8x1xf32, #tpu.memory_space<vmem>>, vector<8x1xf32>,
        %c0_33 = arith.constant 0 : index
        %c0_34 = arith.constant 0 : index
        %46 = vector.load %arg5[%c0_33, %c0_34] : memref<8x1xf32, #tpu.memory_space<vmem>>, vector<8x1xf32>
        %47 = arith.mulf %34, %44 : vector<8x1xf32>
        %48 = arith.subf %46, %47 : vector<8x1xf32>
        %c0_35 = arith.constant 0 : index
        %c0_36 = arith.constant 0 : index
        %49 = vector.load %arg11[%c0_35, %c0_36] : memref<8x1xf32, #tpu.memory_space<vmem>>, vector<8x1xf32>
        tpu.vector_store %arg11[%c0_35, %c0_36], %48 {strides = array<i32>} : memref<8x1xf32, #tpu.memory_space<vmem>>, vector<8x1xf32>,
      } else {
      }
    } else {
    }
    %c1_i32 = arith.constant 1 : i32
    %8 = arith.cmpi eq, %arg0, %c1_i32 : i32
    %9 = arith.extui %8 : i1 to i32
    %c0_i32_4 = arith.constant 0 : i32
    %10 = arith.cmpi ne, %9, %c0_i32_4 : i32
    scf.if %10 {
      %11 = arith.index_cast %arg1 : i32 to index
      %c0 = arith.constant 0 : index
      %c0_5 = arith.constant 0 : index
      %12 = vector.load %arg7[%11, %c0, %c0_5] : memref<1x8x512xf32, #tpu.memory_space<vmem>>, vector<1x8x512xf32>
      %13 = vector.shape_cast %12 : vector<1x8x512xf32> to vector<8x512xf32>
      %c0_6 = arith.constant 0 : index
      %c0_7 = arith.constant 0 : index
      %14 = vector.load %arg10[%c0_6, %c0_7] : memref<8x1xf32, #tpu.memory_space<vmem>>, vector<8x1xf32>
      %15 = vector.broadcast %14 : vector<8x1xf32> to vector<8x512xf32>
      %16 = arith.mulf %13, %15 : vector<8x512xf32>
      %c0_8 = arith.constant 0 : index
      %c0_9 = arith.constant 0 : index
      %17 = vector.load %arg11[%c0_8, %c0_9] : memref<8x1xf32, #tpu.memory_space<vmem>>, vector<8x1xf32>
      %18 = vector.broadcast %17 : vector<8x1xf32> to vector<8x512xf32>
      %19 = arith.addf %16, %18 : vector<8x512xf32>
      %c0_10 = arith.constant 0 : index
      %c0_11 = arith.constant 0 : index
      %20 = vector.load %arg6[%c0_10, %c0_11] : memref<8x512xf32, #tpu.memory_space<vmem>>, vector<8x512xf32>
      tpu.vector_store %arg6[%c0_10, %c0_11], %19 {strides = array<i32>} : memref<8x512xf32, #tpu.memory_space<vmem>>, vector<8x512xf32>,
    } else {
    }
    return
  }
  func.func @transform_0(%arg0: i32, %arg1: i32) -> (i32, i32) {
    %c0_i32 = arith.constant 0 : i32
    %c0_i32_0 = arith.constant 0 : i32
    %c0_i32_1 = arith.constant 0 : i32
    return %c0_i32, %c0_i32_0 : i32, i32
  }
  func.func @transform_1(%arg0: i32, %arg1: i32) -> (i32, i32) {
    %c1_i32 = arith.constant 1 : i32
    %0 = arith.subi %c1_i32, %arg0 : i32
    %1 = arith.muli %arg1, %0 : i32
    %c0_i32 = arith.constant 0 : i32
    %c0_i32_0 = arith.constant 0 : i32
    return %c0_i32, %1 : i32, i32
  }
  func.func @transform_2(%arg0: i32, %arg1: i32) -> (i32, i32) {
    %c0_i32 = arith.constant 0 : i32
    %c0_i32_0 = arith.constant 0 : i32
    %c0_i32_1 = arith.constant 0 : i32
    return %c0_i32, %c0_i32_0 : i32, i32
  }
  func.func @transform_3(%arg0: i32, %arg1: i32) -> (i32, i32) {
    %c0_i32 = arith.constant 0 : i32
    %c0_i32_0 = arith.constant 0 : i32
    %c0_i32_1 = arith.constant 0 : i32
    return %c0_i32, %c0_i32_0 : i32, i32
  }
  func.func @transform_4(%arg0: i32, %arg1: i32) -> (i32, i32) {
    %0 = arith.muli %arg1, %arg0 : i32
    %c0_i32 = arith.constant 0 : i32
    %c0_i32_0 = arith.constant 0 : i32
    return %c0_i32, %0 : i32, i32
  }
}

</mosaic_0001>

<bundles_post_ra>
// kernel: tpu_custom_call.1
= control target key start
LH: loop header
LB: loop body
LE: loop exit
PB: predicated region body
PF: predicated region fallthrough
CT: control target
= control target key end

     0   :  { %9 = vsyncpa [#allocation8], 0  ;;  %s890_s0 = inlined_call_operand.vmem [shape: bf16[8,36], index: 0, kind: input, shape index: {}]   ;;  %s891_s1 = inlined_call_operand.hbm [shape: bf16[36,512], index: 1, kind: input, shape index: {}]   ;;  %s892_s2 = inlined_call_operand.vmem [shape: f32[8,1], index: 2, kind: input, shape index: {}]   ;;  %s893_s3 = inlined_call_operand.vmem [shape: f32[8,1], index: 3, kind: input, shape index: {}]   ;;  %s894_s4 = inlined_call_operand.hbm [shape: f32[8,512], index: 4, kind: output, shape index: {}]  }
   0x1   :  { %11 = vsyncpa [#allocation8 + $0x1], 0 }
   0x2   :  { %12 = vsyncpa [#allocation9], 0 }
   0x3   :  { %14 = vsyncpa [#allocation9 + $0x1], 0  ;;  %s822_s15 = smov 0   ;;  %s824_s16 = smov 0  }
   0x4   :  { %s826_s17 = smov 0  }
   0x5 LB: > { %s583_s18 = sadd.s32 4294967295, %s788_s17   ;;  %s584_s19 = sadd.s32 4294967294, %s788_s17   ;;  %s788_s17 = sphi %s826_s17, %s20_s17   ;;  %s784_s16 = sphi %s824_s16, %s896_s16   ;;  %s780_s15 = sphi %s822_s15, %s895_s15  }
   0x6   : > { %s32_s20 = sadd.s32 1, %s784_s16  ;;  %p586_p0 = scmp.ge.s32.totalorder %s788_s17, 2 }
   0x7   : > { %p34_p1 = scmp.ge.s32.totalorder %s32_s20, 2  ;;  %p658_p2 = scmp.lt.s32.totalorder %s788_s17, 2 }
   0x8   : > { %p659_p3 = scmp.eq.s32.totalorder %s788_s17, 0  ;;  %s192_s23 = sshll.u32 %s891_s1, 4  ;;  %s193_s23 = int_to_ptr.hbm [resolvable:$true] %s192_s23 }
   0x9   : > { %s898_s20 = smov (%p34_p1, %s32_s20), 0  ;;  %s790_s24 = smov [#allocation7]  }
   0xa   : > { %s194_s25 = sshll.u32 %s790_s24, 4  ;;  %p651_p4 = pnand %p659_p3, %p658_p2  ;;  %s195_s25 = int_to_ptr.vmem [resolvable:$true] %s194_s25 }
   0xb   : > { %p588_p5 = scmp.ge.s32.totalorder %s788_s17, 1  ;;  %s791_s26 = smov 256  }
   0xc   : > { %s792_s27 = smov 16   ;;  %p202_p6 = scmp.lt.s32.totalorder %s788_s17, 3 }
   0xd   : > { %653 = dma.hbm_to_vmem [thread:$0]  (!%p651_p4), %s193_s23, 1280, %s195_s25, [#allocation8], %s791_s26, %s791_s26, %s792_s27  }
   0xe   : > { %p203_p7 = pnand %p588_p5, %p202_p6 }
   0xf   : > { %p660_p8 = scmp.eq.s32.totalorder (!%p203_p7), %s583_s18, 0 }
  0x10   : > { %206 = sbr.rel (%p203_p7) target bundleno = 497 (0x1f1), region = 36 }
  0x15   : > { %771 = dma.done.wait (%p660_p8), [#allocation8], 1280  }
  0x16   : > { %773 = vsyncadd (%p660_p8), [#allocation8], 4294966016  ;;  %p244_p9 = scmp.eq.s32.totalorder %s780_s15, 0 }
  0x17   : > { %vm250_vm0 = vcmask (%p244_p9), 7168   ;;  %v793_v0 = vmov (%p244_p9), 0.0  }
  0x18   : > { %249 = sbr.rel (!%p244_p9) target bundleno = 29 (0x1d), region = 44  ;;  %251 = vst.msk [vmem:[#allocation3] sm:$0xff] (%p244_p9), %vm250_vm0, %v793_v0 }
  0x19   : > { %252 = vst.msk [vmem:[#allocation4] sm:$0xff] (%p244_p9), %vm250_vm0, %v793_v0 }
  0x1d PF: > { %p591_p10 = scmp.ne.s32.totalorder %s780_s15, 0 }
  0x1f   : > { %255 = sbr.rel (%p591_p10) target bundleno = 355 (0x163), region = 48 }
  0x24   : > { %v265_v1 = vld [vmem:[#allocation7 + $0x40] sm:$0x33]  ;;  %v266_v2 = vld [vmem:[#allocation7 + $0x48] sm:$0x33]  ;;  %vm321_vm1 = vcmask 1041408   ;;  %vm317_vm2 = vcmask 293888  }
  0x25   : > { %v293_v3 = vunpack.c.l.b16 %v265_v1  ;;  %v294_v4 = vunpack.c.h.b16 %v265_v1  ;;  %v295_v5 = vunpack.c.l.b16 %v266_v2  ;;  %v296_v6 = vunpack.c.h.b16 %v266_v2  ;;  %v610_v7 = vld [vmem:[#allocation7 + $0x20] sm:$0xf]  ;;  %v640_v8 = vld [vmem:[#allocation7 + $0x2c] sm:$0xf0]  ;;  %v638_v13 = vld [vmem:[#allocation7 + $0x24] sm:$0xf] }
  0x26   : > { %v612_v14 = vld [vmem:[#allocation7 + $0x30] sm:$0xf0]  ;;  %v618_v15 = vld [vmem:[#allocation7 + $0x28] sm:$0xf]  ;;  %v641_v16 = vld [vmem:[#allocation7 + $0x34] sm:$0xf0]  ;;  %v611_v23 = vor.u32 %v640_v8, %v610_v7 }
  0x27   : > { %v305_v9 = vpack.c.b16 %v293_v3, %v293_v3  ;;  %v306_v10 = vpack.c.b16 %v294_v4, %v294_v4  ;;  %v307_v11 = vpack.c.b16 %v295_v5, %v295_v5  ;;  %v308_v12 = vpack.c.b16 %v296_v6, %v296_v6  ;;  %v639_v17 = vld [vmem:[#allocation7 + $0x2c] sm:$0xf]  ;;  %v620_v18 = vld [vmem:[#allocation7 + $0x38] sm:$0xf0]  ;;  %v594_v25 = vld [vmem:[#allocation7] sm:$0xf] }
  0x28   : > { %v615_v24 = vor.u32 %v638_v13, %v612_v14  ;;  %v636_v26 = vld [vmem:[#allocation7 + $0xc] sm:$0xf0]  ;;  %v619_v27 = vor.u32 %v641_v16, %v618_v15  ;;  %v623_v28 = vor.u32 %v639_v17, %v620_v18  ;;  %v634_v29 = vld [vmem:[#allocation7 + $0x4] sm:$0xf]  ;;  %v596_v30 = vld [vmem:[#allocation7 + $0x10] sm:$0xf0] }
  0x29   : > { %v323_v19 = vsel %vm321_vm1, %v305_v9, 0  ;;  %v326_v20 = vsel %vm321_vm1, %v306_v10, 0  ;;  %v329_v21 = vsel %vm321_vm1, %v307_v11, 0  ;;  %v332_v22 = vsel %vm321_vm1, %v308_v12, 0  ;;  %v602_v31 = vld [vmem:[#allocation7 + $0x8] sm:$0xf] }
  0x2a   : > { %339 = vmatpush.bf16.msra.mxu0 %v323_v19  ;;  %352 = vmatpush.bf16.msra.mxu1 %v326_v20  ;;  %v637_v32 = vld [vmem:[#allocation7 + $0x14] sm:$0xf0]  ;;  %v635_v33 = vld [vmem:[#allocation7 + $0xc] sm:$0xf]  ;;  %v604_v34 = vld [vmem:[#allocation7 + $0x18] sm:$0xf0]  ;;  %v595_v35 = vor.u32 %v636_v26, %v594_v25  ;;  %v599_v36 = vor.u32 %v634_v29, %v596_v30 }
  0x2b   : > { %365 = vmatpush.bf16.msra.mxu2 %v329_v21  ;;  %378 = vmatpush.bf16.msra.mxu3 %v332_v22  ;;  %v603_v37 = vor.u32 %v637_v32, %v602_v31  ;;  %v607_v38 = vor.u32 %v635_v33, %v604_v34  ;;  %v256_v39 = vld [vmem:[%s890_s0] sm:$0xf]  ;;  %v794_v58 = vmov 512.0   ;;  %vm400_vm3 = vcmask 7168   ;;  %v402_v2 = vld [vmem:[#allocation4] sm:$0xff] }
  0x2c   : > { %695 = vrcp.f32 %v794_v58  ;;  %v393_v61 = vld [vmem:[#allocation3] sm:$0xff] }
  0x2d   : > { %v441_v19 = vld [vmem:[%s892_s2] sm:$0xff] }
  0x2e   : > { %340 = vmatpush.bf16.msra.mxu0 %v611_v23  ;;  %353 = vmatpush.bf16.msra.mxu1 %v615_v24  ;;  %v444_v23 = vld [vmem:[%s893_s3] sm:$0xff] }
  0x2f   : > { %366 = vmatpush.bf16.msra.mxu2 %v619_v27  ;;  %379 = vmatpush.bf16.msra.mxu3 %v623_v28 }
  0x32   : > { %341 = vmatpush.bf16.msra.mxu0 %v595_v35  ;;  %354 = vmatpush.bf16.msra.mxu1 %v599_v36  ;;  %v696_v59 = vpop.eup %695 }
  0x33   : > { %367 = vmatpush.bf16.msra.mxu2 %v603_v37  ;;  %380 = vmatpush.bf16.msra.mxu3 %v607_v38  ;;  %v419_v60 = vmul.f32 512.0, %v696_v59  ;;  %vm423_vm4 = vweird.f32 %v696_v59 }
  0x35   : > { %624 = vmatmul.msk.bf16.vlgmr.msra.gmra.mxu0 %vm317_vm2, %v256_v39  ;;  %625 = vmatmul.msk.bf16.vlgmr.msra.gmra.mxu1 %vm317_vm2, %v256_v39  ;;  %v420_v62 = vsub.f32 1.0, %v419_v60 }
  0x36   : > { %626 = vmatmul.msk.bf16.vlgmr.msra.gmra.mxu2 %vm317_vm2, %v256_v39  ;;  %627 = vmatmul.msk.bf16.vlgmr.msra.gmra.mxu3 %vm317_vm2, %v256_v39 }
  0x37   : > { %v421_v1 = vmul.f32 %v696_v59, %v420_v62 }
  0x39   : > { %v422_v3 = vadd.f32 %v696_v59, %v421_v1 }
  0x3b   : > { %v424_v6 = vsel %vm423_vm4, %v696_v59, %v422_v3 }
  0xb2   : > { %v343_v40 = vpop.f32.mrf.mxu0  ;;  %v356_v41 = vpop.f32.mrf.mxu1 }
  0xb3   : > { %389 = vst [vmem:[#allocation2 + $0x10] sm:$0xff] %v343_v40  ;;  %v394_v42 = vadd.f32 %v356_v41, %v343_v40  ;;  %v403_v43 = vmul.f32 %v343_v40, %v343_v40  ;;  %v404_v44 = vmul.f32 %v356_v41, %v356_v41 }
  0xb4   : > { %390 = vst [vmem:[#allocation2] sm:$0xff] %v356_v41 }
  0xb5   : > { %v407_v52 = vadd.f32 %v404_v44, %v403_v43 }
  0xb9   : > { %v369_v45 = vpop.f32.mrf.mxu2  ;;  %v382_v46 = vpop.f32.mrf.mxu3 }
  0xba   : > { %391 = vst [vmem:[#allocation2 + $0x18] sm:$0xff] %v369_v45  ;;  %v345_v47 = vpop.f32.mrf.mxu0  ;;  %v358_v48 = vpop.f32.mrf.mxu1  ;;  %v395_v49 = vadd.f32 %v394_v42, %v369_v45  ;;  %v405_v50 = vmul.f32 %v369_v45, %v369_v45  ;;  %v406_v53 = vmul.f32 %v382_v46, %v382_v46 }
  0xbb   : > { %392 = vst [vmem:[#allocation2 + $0x8] sm:$0xff] %v382_v46 }
  0xbc   : > { %v396_v51 = vadd.f32 %v395_v49, %v382_v46  ;;  %v408_v54 = vadd.f32 %v407_v52, %v405_v50 }
  0xbe   : > { %397 = vadd.xlane.f32.xlu0 %v396_v51  ;;  %v409_v57 = vadd.f32 %v408_v54, %v406_v53 }
  0xc1   : > { %v371_v55 = vpop.f32.mrf.mxu2  ;;  %v384_v56 = vpop.f32.mrf.mxu3 }
  0xc6   : > { %410 = vadd.xlane.f32.xlu0 %v409_v57 }
 0x131   : > { %v398_v63 = vpop.xlane.xlu0 %397 }
 0x132   : > { %v399_v0 = vadd.f32 %v398_v63, %v393_v61 }
 0x134   : > { %401 = vst.msk [vmem:[#allocation3] sm:$0xff] %vm400_vm3, %v399_v0 }
 0x139   : > { %v411_v4 = vpop.xlane.xlu0 %410 }
 0x13a   : > { %v412_v5 = vadd.f32 %v411_v4, %v402_v2 }
 0x13b   : > { %v417_v7 = vld [vmem:[#allocation3] sm:$0xff] }
 0x13c   : > { %413 = vst.msk [vmem:[#allocation4] sm:$0xff] %vm400_vm3, %v412_v5  ;;  %v425_v8 = vmul.f32 %v424_v6, %v417_v7 }
 0x13e   : > { %v428_v10 = vmul.f32 %v425_v8, %v425_v8 }
 0x143   : > { %v426_v9 = vld [vmem:[#allocation4] sm:$0xff] }
 0x144   : > { %v427_v11 = vmul.f32 %v426_v9, %v424_v6 }
 0x146   : > { %v429_v12 = vsub.f32 %v427_v11, %v428_v10 }
 0x148   : > { %v430_v13 = vadd.f32 1e-05, %v429_v12 }
 0x14a   : > { %697 = vrsqrt.f32 %v430_v13  ;;  %vm437_vm6 = vweird.f32 %v430_v13 }
 0x150   : > { %v698_v14 = vpop.eup %697 }
 0x151   : > { %v432_v15 = vmul.f32 %v698_v14, %v430_v13  ;;  %vm438_vm5 = vweird.f32 %v698_v14 }
 0x152   : > { %vm439_vm7 = vmor %vm437_vm6, %vm438_vm5 }
 0x153   : > { %v433_v16 = vmul.f32 %v698_v14, %v432_v15 }
 0x155   : > { %v434_v17 = vmul.f32 0.5, %v433_v16 }
 0x157   : > { %v435_v18 = vsub.f32 1.5, %v434_v17 }
 0x159   : > { %v436_v20 = vmul.f32 %v698_v14, %v435_v18 }
 0x15b   : > { %v440_v21 = vsel %vm439_vm7, %v698_v14, %v436_v20 }
 0x15c   : > { %v442_v22 = vmul.f32 %v441_v19, %v440_v21 }
 0x15e   : > { %443 = vst.msk [vmem:[#allocation5] sm:$0xff] %vm400_vm3, %v442_v22  ;;  %v445_v24 = vmul.f32 %v442_v22, %v425_v8 }
 0x160   : > { %v446_v25 = vsub.f32 %v444_v23, %v445_v24 }
 0x162   : > { %447 = vst.msk [vmem:[#allocation6] sm:$0xff] %vm400_vm3, %v446_v25 }
 0x163 PF: > { %p628_p11 = scmp.ne.s32.totalorder %s780_s15, 1 }
 0x165   : > { %451 = sbr.rel (%p628_p11) target bundleno = 493 (0x1ed), region = 56 }
 0x16a   : > { %v459_v26 = vld [vmem:[#allocation5] sm:$0xff]  ;;  %v795_v27 = vmov 0   ;;  %v469_v28 = vld [vmem:[#allocation6] sm:$0xff]  ;;  %v456_v31 = vld [vmem:[#allocation2] sm:$0xff] }
 0x16b   : > { %699 = vset.pattern.permute.xlu0 %v795_v27  ;;  %v455_v30 = vld [vmem:[#allocation2 + $0x10] sm:$0xff]  ;;  %v457_v32 = vld [vmem:[#allocation2 + $0x18] sm:$0xff]  ;;  %v458_v33 = vld [vmem:[#allocation2 + $0x8] sm:$0xff] }
 0x16c   : > { %462 = vperm.xlu0 %699, %v459_v26  }
 0x174   : > { %472 = vperm.xlu0 %699, %v469_v28  }
 0x1de   : > { %v463_v29 = vpop.permute.xlu0 %462 }
 0x1df   : > { %v465_v34 = vmul.f32 %v463_v29, %v455_v30  ;;  %v466_v35 = vmul.f32 %v463_v29, %v456_v31  ;;  %v467_v36 = vmul.f32 %v463_v29, %v457_v32  ;;  %v468_v38 = vmul.f32 %v463_v29, %v458_v33 }
 0x1e6   : > { %v473_v37 = vpop.permute.xlu0 %472 }
 0x1e7   : > { %v475_v39 = vadd.f32 %v473_v37, %v465_v34  ;;  %v476_v40 = vadd.f32 %v473_v37, %v466_v35  ;;  %v477_v41 = vadd.f32 %v473_v37, %v467_v36  ;;  %v478_v42 = vadd.f32 %v473_v37, %v468_v38 }
 0x1e9   : > { %479 = vst [vmem:[#allocation10] sm:$0xff] %v475_v39 }
 0x1ea   : > { %480 = vst [vmem:[#allocation10 + $0x8] sm:$0xff] %v476_v40 }
 0x1eb   : > { %481 = vst [vmem:[#allocation10 + $0x10] sm:$0xff] %v477_v41 }
 0x1ec   : > { %482 = vst [vmem:[#allocation10 + $0x18] sm:$0xff] %v478_v42 }
 0x1ed PF: > { %p661_p12 = scmp.eq.s32.totalorder %s583_s18, 1  ;;  %s500_s10 = sshll.u32 %s894_s4, 4  ;;  %s501_s10 = int_to_ptr.hbm [resolvable:$true] %s500_s10 }
 0x1ee   : > { %s796_s11 = smov [#allocation10]  }
 0x1ef   : > { %s498_s12 = sshll.u32 %s796_s11, 4  ;;  %s499_s12 = int_to_ptr.vmem [resolvable:$true] %s498_s12 }
 0x1f0   : > { %647 = dma.vmem_to_hbm [thread:$0]  (%p661_p12), %s499_s12, 512, %s501_s10, [#allocation9]  }
 0x1f1 PF: > { %p663_p13 = scmp.eq.s32.totalorder %s584_s19, 1 }
 0x1f3   : > { %p655_p1 = pnand %p663_p13, %p586_p0 }
 0x1f5   : > { %p656_p2 = pneg %p655_p1 }
 0x1f7   : > { %775 = dma.done.wait (%p656_p2), [#allocation9], 512  }
 0x1f8   : > { %777 = vsyncadd (%p656_p2), [#allocation9], 4294966784  ;;  %s20_s17 = sadd.s32 1, %s788_s17   ;;  %s895_s15 = smov %s784_s16 }
 0x1f9   : > { %p17_p3 = scmp.ge.s32.totalorder %s20_s17, 4   ;;  %s896_s16 = smov %s898_s20 }
 0x1fb   :  { %19 = sbr.rel (!%p17_p3) target bundleno = 5 (0x5), region = 99 }
 0x200   :  { %519 = vsyncpa [#allocation8], 1 }
 0x201   :  { %521 = vsyncpa [#allocation8 + $0x1], 1 }
 0x202   :  { %522 = vsyncpa [#allocation9], 1 }
 0x203   :  { %524 = vsyncpa [#allocation9 + $0x1], 1 }

</bundles_post_ra>
